<compile_context>
chip_gen: v7x
topology: tpu7x:2x2x1
jax: 0.10.0
libtpu: 0.0.40
codegen_flags: <defaults>
</compile_context>

<pallas_src>
import jax
import jax.numpy as jnp
from jax.experimental import pallas as pl
from jax.experimental.pallas import tpu as pltpu

EPS = 1e-5                 # PyTorch BatchNorm2d default eps
LANE = 128                 # TPU lane width: channel axis padded to this
ROW_ALIGN = 16             # row-tile granule (safe for bf16 sublane packing)
STAT_ROWS = 8              # sublane-aligned rows used for per-tile stats
TILE_M_DEFAULT = 512       # rows per tile (fits v7x's 64 MiB VMEM with slack)
VMEM_LIMIT = 32 * 1024 * 1024   # budget valid on v5e / v6e / v7x


# ------------------------------ small helpers -------------------------------

def _round_up(x, m):
    return (x + m - 1) // m * m


def _tiling(m, tile_m):
    """Row tiling: (tile rows, padded M, number of tiles)."""
    tm = min(_round_up(tile_m, ROW_ALIGN), _round_up(m, ROW_ALIGN))
    m_pad = _round_up(m, tm)
    return tm, m_pad, m_pad // tm


def _pad_rows(a, m_pad):
    m = a.shape[0]
    return a if m == m_pad else jnp.pad(a, ((0, m_pad - m), (0, 0)))


def _pad_lanes(v, c_pad):
    """1-D per-channel vector -> (1, c_pad) zero-padded."""
    c = v.shape[0]
    return jnp.pad(v, (0, c_pad - c)).reshape(1, c_pad)


def _w_oihw_to_mat(w, c_pad, dtype=jnp.bfloat16):
    """PyTorch (Cout, Cin, kh, kw) -> (kh*kw*Cin, c_pad) matching _im2col order."""
    cout = w.shape[0]
    m = jnp.transpose(w, (2, 3, 1, 0)).reshape(-1, cout)
    m = jnp.pad(m, ((0, 0), (0, c_pad - cout)))
    return m.astype(dtype)


def _im2col(x_nhwc, ksize, stride, pad):
    """Patch extraction (pure data movement, runs as XLA glue).

    Returns ((N*Ho*Wo, k*k*C) patches, (Ho, Wo)).
    """
    # TODO(synk): replace the HBM-materialized im2col with in-kernel shifted
    # accumulation (halo-DMA of the padded NHWC activation); BlockSpec blocked
    # indexing cannot express the overlapping windows, so it needs manual DMA.
    N, H, W, C = x_nhwc.shape
    xp = jnp.pad(x_nhwc, ((0, 0), (pad, pad), (pad, pad), (0, 0)))
    Ho = (H + 2 * pad - ksize) // stride + 1
    Wo = (W + 2 * pad - ksize) // stride + 1
    cols = []
    for dh in range(ksize):
        for dw in range(ksize):
            cols.append(xp[:, dh::stride, dw::stride, :][:, :Ho, :Wo, :])
    patches = jnp.concatenate(cols, axis=-1)   # column order: (kh, kw, cin)
    return patches.reshape(N * Ho * Wo, ksize * ksize * C), (Ho, Wo)


def _compiler_params():
    return pltpu.CompilerParams(
        dimension_semantics=("parallel",),     # M-tile axis -> both TCs on v7x
        vmem_limit_bytes=VMEM_LIMIT)


def _scale_shift(mean, var, gamma, beta, c_pad):
    """Fold gamma/beta/mean/var into per-channel scale & shift (128-wide glue)."""
    scale = (gamma.reshape(-1) * jax.lax.rsqrt(var + EPS)).reshape(1, c_pad)
    shift = beta.reshape(1, c_pad) - mean.reshape(1, c_pad) * scale
    return scale, shift


# ------------------------------ Pallas kernels ------------------------------

def _conv_stats_kernel(p_ref, w_ref, y_ref, st_ref):
    """One M-tile of conv-as-matmul fused with per-tile BatchNorm partials.

    p_ref : (TM, K)  bf16   im2col patches for this row tile
    w_ref : (K, Cp)  bf16   weight matrix (zero-padded to Cp=128 lanes)
    y_ref : (TM, Cp) f32    raw conv output tile (single HBM write)
    st_ref: (8, Cp)  f32    row 0 = per-channel sum, row 1 = per-channel sumsq
    """
    y = jnp.dot(p_ref[...], w_ref[...], preferred_element_type=jnp.float32)
    y_ref[...] = y
    s = jnp.sum(y, axis=0, keepdims=True)
    sq = jnp.sum(y * y, axis=0, keepdims=True)
    pad = jnp.zeros((STAT_ROWS - 2, y.shape[1]), jnp.float32)
    st_ref[...] = jnp.concatenate([s, sq, pad], axis=0)   # one lane-dense store


def _bn_relu_kernel(y_ref, sc_ref, sh_ref, o_ref):
    # y * scale + shift, ReLU; output cast to o_ref's dtype (bf16 here).
    o_ref[...] = jnp.maximum(
        y_ref[...] * sc_ref[...] + sh_ref[...], 0.0).astype(o_ref.dtype)


def _bn_shortcut_add_relu_kernel(y_ref, sc_ref, sh_ref, x_ref, w_ref, o_ref):
    """BN2 normalize + fused 1x1 shortcut conv (+ bias folded into shift)
    + residual add + ReLU.  Output aliases y_ref's HBM buffer."""
    res = jnp.dot(x_ref[...], w_ref[...], preferred_element_type=jnp.float32)
    o_ref[...] = jnp.maximum(
        y_ref[...] * sc_ref[...] + sh_ref[...] + res, 0.0)


# --------------------------- pallas_call wrappers ---------------------------

def pallas_conv_stats(patches, w_mat, *, tile_m):
    """Tiled conv matmul fused with per-channel sum / sum-of-squares.

    Returns (y_padded (m_pad, Cp) f32, mean (Cp,), var (Cp,)).
    Zero-padded rows contribute 0 to the sums (no bias), so statistics use
    the true row count m.
    """
    m, k = patches.shape
    c_pad = w_mat.shape[1]
    tm, m_pad, nt = _tiling(m, tile_m)
    p = _pad_rows(patches, m_pad).astype(jnp.bfloat16)

    y, st = pl.pallas_call(
        _conv_stats_kernel,
        out_shape=(jax.ShapeDtypeStruct((m_pad, c_pad), jnp.float32),
                   jax.ShapeDtypeStruct((nt * STAT_ROWS, c_pad), jnp.float32)),
        grid=(nt,),
        in_specs=[pl.BlockSpec((tm, k), lambda i: (i, 0)),
                  pl.BlockSpec((k, c_pad), lambda i: (0, 0))],
        out_specs=[pl.BlockSpec((tm, c_pad), lambda i: (i, 0)),
                   pl.BlockSpec((STAT_ROWS, c_pad), lambda i: (i, 0))],
        compiler_params=_compiler_params(),
    )(p, w_mat)

    st = st.reshape(nt, STAT_ROWS, c_pad)
    ssum = jnp.sum(st[:, 0, :], axis=0)
    ssq = jnp.sum(st[:, 1, :], axis=0)
    mean = ssum / m
    var = jnp.maximum(ssq / m - mean * mean, 0.0)   # biased (training-mode) var
    return y, mean, var


def pallas_bn_relu(y_pad, mean, var, gamma, beta, *, tile_m,
                   out_dtype=jnp.bfloat16):
    """Fused BatchNorm normalize + ReLU over row tiles (bf16 output: the
    result is consumed only as bf16 MXU operands by the next conv)."""
    m_pad, c_pad = y_pad.shape
    tm, m_pad2, nt = _tiling(m_pad, tile_m)
    assert m_pad2 == m_pad

    scale, shift = _scale_shift(mean, var, gamma, beta, c_pad)

    row_spec = pl.BlockSpec((tm, c_pad), lambda i: (i, 0))
    vec_spec = pl.BlockSpec((1, c_pad), lambda i: (0, 0))
    return pl.pallas_call(
        _bn_relu_kernel,
        out_shape=jax.ShapeDtypeStruct((m_pad, c_pad), out_dtype),
        grid=(nt,),
        in_specs=[row_spec, vec_spec, vec_spec],
        out_specs=row_spec,
        compiler_params=_compiler_params(),
    )(y_pad, scale, shift)


def pallas_bn_shortcut_add_relu(y_pad, mean, var, gamma, beta, bias,
                                xs, w_mat, *, tile_m):
    """Tail kernel: BN2 normalize + fused 1x1 shortcut conv (xs @ W3 + b3)
    + residual add + ReLU.  b3 is folded into the BN shift; the output reuses
    the raw-conv2 HBM buffer via input_output_aliases."""
    m_pad, c_pad = y_pad.shape
    tm, m_pad2, nt = _tiling(m_pad, tile_m)
    assert m_pad2 == m_pad
    cin = xs.shape[1]
    xsb = _pad_rows(xs, m_pad).astype(jnp.bfloat16)

    scale, shift = _scale_shift(mean, var, gamma, beta, c_pad)
    shift = shift + bias.reshape(1, c_pad)      # fold shortcut bias into shift

    row_spec = pl.BlockSpec((tm, c_pad), lambda i: (i, 0))
    vec_spec = pl.BlockSpec((1, c_pad), lambda i: (0, 0))
    return pl.pallas_call(
        _bn_shortcut_add_relu_kernel,
        out_shape=jax.ShapeDtypeStruct((m_pad, c_pad), jnp.float32),
        grid=(nt,),
        in_specs=[row_spec, vec_spec, vec_spec,
                  pl.BlockSpec((tm, cin), lambda i: (i, 0)),
                  pl.BlockSpec((cin, c_pad), lambda i: (0, 0))],
        out_specs=row_spec,
        input_output_aliases={0: 0},   # write result into the conv2 buffer
        compiler_params=_compiler_params(),
    )(y_pad, scale, shift, xsb, w_mat)


# ------------------------------ forward pass --------------------------------

def residual_forward(x_nchw, params, *, strides, tile_m=TILE_M_DEFAULT):
    """Pallas implementation of Residual.forward (training-mode BatchNorm)."""
    x = jnp.transpose(x_nchw, (0, 2, 3, 1)).astype(jnp.float32)   # NCHW -> NHWC
    n, h, w, cin = x.shape
    cout = params["w1"].shape[0]
    c_pad = _round_up(cout, LANE)

    w1 = _w_oihw_to_mat(params["w1"], c_pad)
    w2 = _w_oihw_to_mat(params["w2"], c_pad)
    w3 = _w_oihw_to_mat(params["w3"], c_pad)
    g1, be1 = _pad_lanes(params["g1"], c_pad), _pad_lanes(params["be1"], c_pad)
    g2, be2 = _pad_lanes(params["g2"], c_pad), _pad_lanes(params["be2"], c_pad)
    b3 = _pad_lanes(params["b3"], c_pad)
    # b1 / b2 intentionally unused: a conv bias feeding training-mode BatchNorm
    # is cancelled exactly by the mean subtraction.

    # conv1 (3x3, stride=strides, pad=1) fused with bn1 statistics,
    # then fused normalize + ReLU (bf16 output for the next conv's MXU).
    p1, (ho1, wo1) = _im2col(x, 3, strides, 1)
    m1 = n * ho1 * wo1
    y1_raw, mean1, var1 = pallas_conv_stats(p1, w1, tile_m=tile_m)
    y1 = pallas_bn_relu(y1_raw, mean1, var1, g1, be1, tile_m=tile_m)
    y1 = y1[:m1, :cout].reshape(n, ho1, wo1, cout)

    # conv2 (3x3, stride=1, pad=1) fused with bn2 statistics.
    p2, (ho2, wo2) = _im2col(y1, 3, 1, 1)
    m2 = n * ho2 * wo2
    y2_raw, mean2, var2 = pallas_conv_stats(p2, w2, tile_m=tile_m)

    # Tail: bn2 normalize + fused 1x1 shortcut conv + residual add + ReLU.
    xs = x[:, ::strides, ::strides, :].reshape(m2, cin)
    out = pallas_bn_shortcut_add_relu(y2_raw, mean2, var2, g2, be2, b3,
                                      xs, w3, tile_m=tile_m)
    out = out[:m2, :cout].reshape(n, ho2, wo2, cout)
    return jnp.transpose(out, (0, 3, 1, 2))   # NHWC -> NCHW


# ------------------------ pure-JAX reference (check) ------------------------

def reference_forward(x_nchw, params, strides, conv_dtype=jnp.float32):
    """Pure-JAX reference.  conv_dtype=bfloat16 reproduces the kernel's MXU
    arithmetic (bf16 operands, f32 accumulation, f32 training-mode BN)."""
    def conv(x, w, b, stride, pad):
        y = jax.lax.conv_general_dilated(
            x.astype(conv_dtype), w.astype(conv_dtype), (stride, stride),
            [(pad, pad), (pad, pad)],
            dimension_numbers=("NCHW", "OIHW", "NCHW"),
            preferred_element_type=jnp.float32)
        return y + b[None, :, None, None]

    def bn(y, g, b):
        mean = jnp.mean(y, axis=(0, 2, 3), keepdims=True)
        var = jnp.mean((y - mean) ** 2, axis=(0, 2, 3), keepdims=True)
        return ((y - mean) * jax.lax.rsqrt(var + EPS)
                * g[None, :, None, None] + b[None, :, None, None])

    y = jax.nn.relu(bn(conv(x_nchw, params["w1"], params["b1"], strides, 1),
                       params["g1"], params["be1"]))
    y = bn(conv(y, params["w2"], params["b2"], 1, 1),
           params["g2"], params["be2"])
    xs = conv(x_nchw, params["w3"], params["b3"], strides, 0)
    return jax.nn.relu(y + xs)


# ---------------------------------- main -------------------------------------

if __name__ == "__main__":
    # Small, deterministic config: Residual(4, 8, use_1x1conv=True, strides=2)
    n, cin, cout, h, w_sp, strides = 2, 4, 8, 16, 16, 2

    key = jax.random.PRNGKey(0)
    keys = jax.random.split(key, 10)
    params = {
        "w1": 0.1 * jax.random.normal(keys[0], (cout, cin, 3, 3), jnp.float32),
        "b1": 0.1 * jax.random.normal(keys[1], (cout,), jnp.float32),
        "w2": 0.1 * jax.random.normal(keys[2], (cout, cout, 3, 3), jnp.float32),
        "b2": 0.1 * jax.random.normal(keys[3], (cout,), jnp.float32),
        "w3": 0.1 * jax.random.normal(keys[4], (cout, cin, 1, 1), jnp.float32),
        "b3": 0.1 * jax.random.normal(keys[5], (cout,), jnp.float32),
        "g1": jnp.ones((cout,), jnp.float32),
        "be1": jnp.zeros((cout,), jnp.float32),
        "g2": jnp.ones((cout,), jnp.float32),
        "be2": jnp.zeros((cout,), jnp.float32),
    }
    x = jax.random.uniform(keys[6], (n, cin, h, w_sp), jnp.float32)

    fwd = jax.jit(residual_forward, static_argnames=("strides", "tile_m"))

    # Default tiling (single row tile at this toy size) plus a deliberately
    # small tile (tile_m=32 -> 4 row tiles) to exercise the cross-tile
    # BatchNorm-statistics path.
    out = jax.block_until_ready(fwd(x, params, strides=strides))
    out_tiled = jax.block_until_ready(fwd(x, params, strides=strides, tile_m=32))

    # Reference with identical arithmetic to the kernels (bf16 MXU operands,
    # f32 accumulation, f32 BatchNorm) -> tight check.
    ref_bf16 = reference_forward(x, params, strides, conv_dtype=jnp.bfloat16)
    # Exact f32 module semantics -> loose sanity bound (bf16 conv rounding is
    # amplified by the BatchNorm normalization).
    ref_f32 = reference_forward(x, params, strides, conv_dtype=jnp.float32)

    assert out.shape == (n, cout, h // strides, w_sp // strides), out.shape
    assert jnp.allclose(out, ref_bf16, atol=1e-2, rtol=1e-2), (
        float(jnp.max(jnp.abs(out - ref_bf16))))
    assert jnp.allclose(out_tiled, ref_bf16, atol=1e-2, rtol=1e-2), (
        float(jnp.max(jnp.abs(out_tiled - ref_bf16))))
    assert float(jnp.max(jnp.abs(out - ref_f32))) < 0.3

    print("KERNEL_OK")
</pallas_src>

<mosaic_0001>
module attributes {stable_mosaic.version = 11 : i64} {
  func.func @_conv_stats_kernel(%arg0: i32, %arg1: memref<128x36xbf16, #tpu.memory_space<vmem>>, %arg2: memref<36x128xbf16, #tpu.memory_space<vmem>>, %arg3: memref<128x128xf32, #tpu.memory_space<vmem>>, %arg4: memref<8x128xf32, #tpu.memory_space<vmem>>) attributes {dimension_semantics = [#tpu.dimension_semantics<parallel>], iteration_bounds = array<i64: 1>, scalar_prefetch = 0 : i64, scratch_operands = 0 : i64, tpu.core_type = #tpu.core_type<tc>, window_params = [{transform_indices = @transform_0, window_bounds = array<i64: 128, 36>}, {pipeline_mode = #tpu.pipeline_mode<synchronous>, transform_indices = @transform_1, window_bounds = array<i64: 36, 128>}, {transform_indices = @transform_2, window_bounds = array<i64: 128, 128>}, {transform_indices = @transform_3, window_bounds = array<i64: 8, 128>}]} {
    %c0 = arith.constant 0 : index
    %c0_0 = arith.constant 0 : index
    %0 = vector.load %arg1[%c0, %c0_0] : memref<128x36xbf16, #tpu.memory_space<vmem>>, vector<128x36xbf16>
    %c0_1 = arith.constant 0 : index
    %c0_2 = arith.constant 0 : index
    %1 = vector.load %arg2[%c0_1, %c0_2] : memref<36x128xbf16, #tpu.memory_space<vmem>>, vector<36x128xbf16>
    %cst = arith.constant dense<0.000000e+00> : vector<128x128xf32>
    %2 = tpu.matmul %0, %1, %cst {dimension_numbers = #tpu.dot_dimension_numbers<[1], [0], [0], [1], [0, 0, 1, 1], [], []>} : vector<128x36xbf16>, vector<36x128xbf16>, vector<128x128xf32> -> vector<128x128xf32>
    %c0_3 = arith.constant 0 : index
    %c0_4 = arith.constant 0 : index
    %3 = vector.load %arg3[%c0_3, %c0_4] : memref<128x128xf32, #tpu.memory_space<vmem>>, vector<128x128xf32>
    tpu.vector_store %arg3[%c0_3, %c0_4], %2 {strides = array<i32>} : memref<128x128xf32, #tpu.memory_space<vmem>>, vector<128x128xf32>,
    %cst_5 = arith.constant dense<0.000000e+00> : vector<128xf32>
    %4 = vector.multi_reduction <add>, %2, %cst_5 [0] : vector<128x128xf32> to vector<128xf32>
    %5 = vector.shape_cast %4 : vector<128xf32> to vector<1x128xf32>
    %6 = arith.mulf %2, %2 : vector<128x128xf32>
    %cst_6 = arith.constant dense<0.000000e+00> : vector<128xf32>
    %7 = vector.multi_reduction <add>, %6, %cst_6 [0] : vector<128x128xf32> to vector<128xf32>
    %8 = vector.shape_cast %7 : vector<128xf32> to vector<1x128xf32>
    %cst_7 = arith.constant 0.000000e+00 : f32
    %9 = vector.broadcast %cst_7 : f32 to vector<6x128xf32>
    %10 = tpu.concatenate %5, %8, %9 in 0 : vector<1x128xf32>, vector<1x128xf32>, vector<6x128xf32> -> vector<8x128xf32>
    %c0_8 = arith.constant 0 : index
    %c0_9 = arith.constant 0 : index
    %11 = vector.load %arg4[%c0_8, %c0_9] : memref<8x128xf32, #tpu.memory_space<vmem>>, vector<8x128xf32>
    tpu.vector_store %arg4[%c0_8, %c0_9], %10 {strides = array<i32>} : memref<8x128xf32, #tpu.memory_space<vmem>>, vector<8x128xf32>,
    return
  }
  func.func @transform_0(%arg0: i32) -> (i32, i32) {
    %c0_i32 = arith.constant 0 : i32
    %c0_i32_0 = arith.constant 0 : i32
    return %arg0, %c0_i32 : i32, i32
  }
  func.func @transform_1(%arg0: i32) -> (i32, i32) {
    %c0_i32 = arith.constant 0 : i32
    %c0_i32_0 = arith.constant 0 : i32
    %c0_i32_1 = arith.constant 0 : i32
    return %c0_i32, %c0_i32_0 : i32, i32
  }
  func.func @transform_2(%arg0: i32) -> (i32, i32) {
    %c0_i32 = arith.constant 0 : i32
    %c0_i32_0 = arith.constant 0 : i32
    return %arg0, %c0_i32 : i32, i32
  }
  func.func @transform_3(%arg0: i32) -> (i32, i32) {
    %c0_i32 = arith.constant 0 : i32
    %c0_i32_0 = arith.constant 0 : i32
    return %arg0, %c0_i32 : i32, i32
  }
}

module attributes {stable_mosaic.version = 11 : i64} {
  func.func @_bn_relu_kernel(%arg0: i32, %arg1: memref<128x128xf32, #tpu.memory_space<vmem>>, %arg2: memref<1x128xf32, #tpu.memory_space<vmem>>, %arg3: memref<1x128xf32, #tpu.memory_space<vmem>>, %arg4: memref<128x128xbf16, #tpu.memory_space<vmem>>) attributes {dimension_semantics = [#tpu.dimension_semantics<parallel>], iteration_bounds = array<i64: 1>, scalar_prefetch = 0 : i64, scratch_operands = 0 : i64, tpu.core_type = #tpu.core_type<tc>, window_params = [{transform_indices = @transform_0, window_bounds = array<i64: 128, 128>}, {pipeline_mode = #tpu.pipeline_mode<synchronous>, transform_indices = @transform_1, window_bounds = array<i64: 1, 128>}, {pipeline_mode = #tpu.pipeline_mode<synchronous>, transform_indices = @transform_2, window_bounds = array<i64: 1, 128>}, {transform_indices = @transform_3, window_bounds = array<i64: 128, 128>}]} {
    %c0 = arith.constant 0 : index
    %c0_0 = arith.constant 0 : index
    %0 = vector.load %arg1[%c0, %c0_0] : memref<128x128xf32, #tpu.memory_space<vmem>>, vector<128x128xf32>
    %c0_1 = arith.constant 0 : index
    %c0_2 = arith.constant 0 : index
    %1 = vector.load %arg2[%c0_1, %c0_2] : memref<1x128xf32, #tpu.memory_space<vmem>>, vector<1x128xf32>
    %2 = vector.broadcast %1 : vector<1x128xf32> to vector<128x128xf32>
    %3 = arith.mulf %0, %2 : vector<128x128xf32>
    %c0_3 = arith.constant 0 : index
    %c0_4 = arith.constant 0 : index
    %4 = vector.load %arg3[%c0_3, %c0_4] : memref<1x128xf32, #tpu.memory_space<vmem>>, vector<1x128xf32>
    %5 = vector.broadcast %4 : vector<1x128xf32> to vector<128x128xf32>
    %6 = arith.addf %3, %5 : vector<128x128xf32>
    %cst = arith.constant 0.000000e+00 : f32
    %7 = vector.broadcast %cst : f32 to vector<128x128xf32>
    %8 = arith.maximumf %6, %7 : vector<128x128xf32>
    %9 = arith.truncf %8 : vector<128x128xf32> to vector<128x128xbf16>
    %c0_5 = arith.constant 0 : index
    %c0_6 = arith.constant 0 : index
    %10 = vector.load %arg4[%c0_5, %c0_6] : memref<128x128xbf16, #tpu.memory_space<vmem>>, vector<128x128xbf16>
    tpu.vector_store %arg4[%c0_5, %c0_6], %9 {strides = array<i32>} : memref<128x128xbf16, #tpu.memory_space<vmem>>, vector<128x128xbf16>,
    return
  }
  func.func @transform_0(%arg0: i32) -> (i32, i32) {
    %c0_i32 = arith.constant 0 : i32
    %c0_i32_0 = arith.constant 0 : i32
    return %arg0, %c0_i32 : i32, i32
  }
  func.func @transform_1(%arg0: i32) -> (i32, i32) {
    %c0_i32 = arith.constant 0 : i32
    %c0_i32_0 = arith.constant 0 : i32
    %c0_i32_1 = arith.constant 0 : i32
    return %c0_i32, %c0_i32_0 : i32, i32
  }
  func.func @transform_2(%arg0: i32) -> (i32, i32) {
    %c0_i32 = arith.constant 0 : i32
    %c0_i32_0 = arith.constant 0 : i32
    %c0_i32_1 = arith.constant 0 : i32
    return %c0_i32, %c0_i32_0 : i32, i32
  }
  func.func @transform_3(%arg0: i32) -> (i32, i32) {
    %c0_i32 = arith.constant 0 : i32
    %c0_i32_0 = arith.constant 0 : i32
    return %arg0, %c0_i32 : i32, i32
  }
}

module attributes {stable_mosaic.version = 11 : i64} {
  func.func @_conv_stats_kernel(%arg0: i32, %arg1: memref<128x72xbf16, #tpu.memory_space<vmem>>, %arg2: memref<72x128xbf16, #tpu.memory_space<vmem>>, %arg3: memref<128x128xf32, #tpu.memory_space<vmem>>, %arg4: memref<8x128xf32, #tpu.memory_space<vmem>>) attributes {dimension_semantics = [#tpu.dimension_semantics<parallel>], iteration_bounds = array<i64: 1>, scalar_prefetch = 0 : i64, scratch_operands = 0 : i64, tpu.core_type = #tpu.core_type<tc>, window_params = [{transform_indices = @transform_0, window_bounds = array<i64: 128, 72>}, {pipeline_mode = #tpu.pipeline_mode<synchronous>, transform_indices = @transform_1, window_bounds = array<i64: 72, 128>}, {transform_indices = @transform_2, window_bounds = array<i64: 128, 128>}, {transform_indices = @transform_3, window_bounds = array<i64: 8, 128>}]} {
    %c0 = arith.constant 0 : index
    %c0_0 = arith.constant 0 : index
    %0 = vector.load %arg1[%c0, %c0_0] : memref<128x72xbf16, #tpu.memory_space<vmem>>, vector<128x72xbf16>
    %c0_1 = arith.constant 0 : index
    %c0_2 = arith.constant 0 : index
    %1 = vector.load %arg2[%c0_1, %c0_2] : memref<72x128xbf16, #tpu.memory_space<vmem>>, vector<72x128xbf16>
    %cst = arith.constant dense<0.000000e+00> : vector<128x128xf32>
    %2 = tpu.matmul %0, %1, %cst {dimension_numbers = #tpu.dot_dimension_numbers<[1], [0], [0], [1], [0, 0, 1, 1], [], []>} : vector<128x72xbf16>, vector<72x128xbf16>, vector<128x128xf32> -> vector<128x128xf32>
    %c0_3 = arith.constant 0 : index
    %c0_4 = arith.constant 0 : index
    %3 = vector.load %arg3[%c0_3, %c0_4] : memref<128x128xf32, #tpu.memory_space<vmem>>, vector<128x128xf32>
    tpu.vector_store %arg3[%c0_3, %c0_4], %2 {strides = array<i32>} : memref<128x128xf32, #tpu.memory_space<vmem>>, vector<128x128xf32>,
    %cst_5 = arith.constant dense<0.000000e+00> : vector<128xf32>
    %4 = vector.multi_reduction <add>, %2, %cst_5 [0] : vector<128x128xf32> to vector<128xf32>
    %5 = vector.shape_cast %4 : vector<128xf32> to vector<1x128xf32>
    %6 = arith.mulf %2, %2 : vector<128x128xf32>
    %cst_6 = arith.constant dense<0.000000e+00> : vector<128xf32>
    %7 = vector.multi_reduction <add>, %6, %cst_6 [0] : vector<128x128xf32> to vector<128xf32>
    %8 = vector.shape_cast %7 : vector<128xf32> to vector<1x128xf32>
    %cst_7 = arith.constant 0.000000e+00 : f32
    %9 = vector.broadcast %cst_7 : f32 to vector<6x128xf32>
    %10 = tpu.concatenate %5, %8, %9 in 0 : vector<1x128xf32>, vector<1x128xf32>, vector<6x128xf32> -> vector<8x128xf32>
    %c0_8 = arith.constant 0 : index
    %c0_9 = arith.constant 0 : index
    %11 = vector.load %arg4[%c0_8, %c0_9] : memref<8x128xf32, #tpu.memory_space<vmem>>, vector<8x128xf32>
    tpu.vector_store %arg4[%c0_8, %c0_9], %10 {strides = array<i32>} : memref<8x128xf32, #tpu.memory_space<vmem>>, vector<8x128xf32>,
    return
  }
  func.func @transform_0(%arg0: i32) -> (i32, i32) {
    %c0_i32 = arith.constant 0 : i32
    %c0_i32_0 = arith.constant 0 : i32
    return %arg0, %c0_i32 : i32, i32
  }
  func.func @transform_1(%arg0: i32) -> (i32, i32) {
    %c0_i32 = arith.constant 0 : i32
    %c0_i32_0 = arith.constant 0 : i32
    %c0_i32_1 = arith.constant 0 : i32
    return %c0_i32, %c0_i32_0 : i32, i32
  }
  func.func @transform_2(%arg0: i32) -> (i32, i32) {
    %c0_i32 = arith.constant 0 : i32
    %c0_i32_0 = arith.constant 0 : i32
    return %arg0, %c0_i32 : i32, i32
  }
  func.func @transform_3(%arg0: i32) -> (i32, i32) {
    %c0_i32 = arith.constant 0 : i32
    %c0_i32_0 = arith.constant 0 : i32
    return %arg0, %c0_i32 : i32, i32
  }
}

module attributes {stable_mosaic.version = 11 : i64} {
  func.func @_bn_shortcut_add_relu_kernel(%arg0: i32, %arg1: memref<128x128xf32, #tpu.memory_space<vmem>>, %arg2: memref<1x128xf32, #tpu.memory_space<vmem>>, %arg3: memref<1x128xf32, #tpu.memory_space<vmem>>, %arg4: memref<128x4xbf16, #tpu.memory_space<vmem>>, %arg5: memref<4x128xbf16, #tpu.memory_space<vmem>>, %arg6: memref<128x128xf32, #tpu.memory_space<vmem>>) attributes {dimension_semantics = [#tpu.dimension_semantics<parallel>], iteration_bounds = array<i64: 1>, scalar_prefetch = 0 : i64, scratch_operands = 0 : i64, tpu.core_type = #tpu.core_type<tc>, window_params = [{transform_indices = @transform_0, window_bounds = array<i64: 128, 128>}, {pipeline_mode = #tpu.pipeline_mode<synchronous>, transform_indices = @transform_1, window_bounds = array<i64: 1, 128>}, {pipeline_mode = #tpu.pipeline_mode<synchronous>, transform_indices = @transform_2, window_bounds = array<i64: 1, 128>}, {transform_indices = @transform_3, window_bounds = array<i64: 128, 4>}, {pipeline_mode = #tpu.pipeline_mode<synchronous>, transform_indices = @transform_4, window_bounds = array<i64: 4, 128>}, {transform_indices = @transform_5, window_bounds = array<i64: 128, 128>}]} {
    %c0 = arith.constant 0 : index
    %c0_0 = arith.constant 0 : index
    %0 = vector.load %arg4[%c0, %c0_0] : memref<128x4xbf16, #tpu.memory_space<vmem>>, vector<128x4xbf16>
    %c0_1 = arith.constant 0 : index
    %c0_2 = arith.constant 0 : index
    %1 = vector.load %arg5[%c0_1, %c0_2] : memref<4x128xbf16, #tpu.memory_space<vmem>>, vector<4x128xbf16>
    %cst = arith.constant dense<0.000000e+00> : vector<128x128xf32>
    %2 = tpu.matmul %0, %1, %cst {dimension_numbers = #tpu.dot_dimension_numbers<[1], [0], [0], [1], [0, 0, 1, 1], [], []>} : vector<128x4xbf16>, vector<4x128xbf16>, vector<128x128xf32> -> vector<128x128xf32>
    %c0_3 = arith.constant 0 : index
    %c0_4 = arith.constant 0 : index
    %3 = vector.load %arg1[%c0_3, %c0_4] : memref<128x128xf32, #tpu.memory_space<vmem>>, vector<128x128xf32>
    %c0_5 = arith.constant 0 : index
    %c0_6 = arith.constant 0 : index
    %4 = vector.load %arg2[%c0_5, %c0_6] : memref<1x128xf32, #tpu.memory_space<vmem>>, vector<1x128xf32>
    %5 = vector.broadcast %4 : vector<1x128xf32> to vector<128x128xf32>
    %6 = arith.mulf %3, %5 : vector<128x128xf32>
    %c0_7 = arith.constant 0 : index
    %c0_8 = arith.constant 0 : index
    %7 = vector.load %arg3[%c0_7, %c0_8] : memref<1x128xf32, #tpu.memory_space<vmem>>, vector<1x128xf32>
    %8 = vector.broadcast %7 : vector<1x128xf32> to vector<128x128xf32>
    %9 = arith.addf %6, %8 : vector<128x128xf32>
    %10 = arith.addf %9, %2 : vector<128x128xf32>
    %cst_9 = arith.constant 0.000000e+00 : f32
    %11 = vector.broadcast %cst_9 : f32 to vector<128x128xf32>
    %12 = arith.maximumf %10, %11 : vector<128x128xf32>
    %c0_10 = arith.constant 0 : index
    %c0_11 = arith.constant 0 : index
    %13 = vector.load %arg6[%c0_10, %c0_11] : memref<128x128xf32, #tpu.memory_space<vmem>>, vector<128x128xf32>
    tpu.vector_store %arg6[%c0_10, %c0_11], %12 {strides = array<i32>} : memref<128x128xf32, #tpu.memory_space<vmem>>, vector<128x128xf32>,
    return
  }
  func.func @transform_0(%arg0: i32) -> (i32, i32) {
    %c0_i32 = arith.constant 0 : i32
    %c0_i32_0 = arith.constant 0 : i32
    return %arg0, %c0_i32 : i32, i32
  }
  func.func @transform_1(%arg0: i32) -> (i32, i32) {
    %c0_i32 = arith.constant 0 : i32
    %c0_i32_0 = arith.constant 0 : i32
    %c0_i32_1 = arith.constant 0 : i32
    return %c0_i32, %c0_i32_0 : i32, i32
  }
  func.func @transform_2(%arg0: i32) -> (i32, i32) {
    %c0_i32 = arith.constant 0 : i32
    %c0_i32_0 = arith.constant 0 : i32
    %c0_i32_1 = arith.constant 0 : i32
    return %c0_i32, %c0_i32_0 : i32, i32
  }
  func.func @transform_3(%arg0: i32) -> (i32, i32) {
    %c0_i32 = arith.constant 0 : i32
    %c0_i32_0 = arith.constant 0 : i32
    return %arg0, %c0_i32 : i32, i32
  }
  func.func @transform_4(%arg0: i32) -> (i32, i32) {
    %c0_i32 = arith.constant 0 : i32
    %c0_i32_0 = arith.constant 0 : i32
    %c0_i32_1 = arith.constant 0 : i32
    return %c0_i32, %c0_i32_0 : i32, i32
  }
  func.func @transform_5(%arg0: i32) -> (i32, i32) {
    %c0_i32 = arith.constant 0 : i32
    %c0_i32_0 = arith.constant 0 : i32
    return %arg0, %c0_i32 : i32, i32
  }
}

</mosaic_0001>

<bundles_post_ra>
// kernel: residual_forward.5
= control target key start
LH: loop header
LB: loop body
LE: loop exit
PB: predicated region body
PF: predicated region fallthrough
CT: control target
= control target key end

     0   :  { %s391_s0 = inlined_call_operand.vmem [shape: f32[128,128], index: 0, kind: input, shape index: {}]   ;;  %s392_s1 = inlined_call_operand.vmem [shape: f32[1,128], index: 1, kind: input, shape index: {}]   ;;  %s393_s2 = inlined_call_operand.vmem [shape: f32[1,128], index: 2, kind: input, shape index: {}]   ;;  %s394_s3 = inlined_call_operand.vmem [shape: bf16[128,128], index: 3, kind: output, shape index: {}]  }
   0x1   :  { %v14_v0 = vld [vmem:[%s391_s0] sm:$0xff]  ;;  %v15_v1 = vld [vmem:[%s391_s0 + $0x8] sm:$0xff]  ;;  %v16_v6 = vld [vmem:[%s391_s0 + $0x10] sm:$0xff] }
   0x2   :  { %v286_v2 = vld [vmem:[%s392_s1] ss:$0 sm:$0xff]  ;;  %v17_v7 = vld [vmem:[%s391_s0 + $0x18] sm:$0xff]  ;;  %v19_v11 = vld [vmem:[%s391_s0 + $0x28] sm:$0xff] }
   0x3   :  { %v37_v3 = vmul.f32 %v286_v2, %v14_v0  ;;  %v38_v4 = vmul.f32 %v286_v2, %v15_v1  ;;  %v293_v5 = vld [vmem:[%s393_s2] ss:$0 sm:$0xff]  ;;  %v39_v8 = vmul.f32 %v286_v2, %v16_v6  ;;  %v40_v9 = vmul.f32 %v286_v2, %v17_v7  ;;  %v20_v12 = vld [vmem:[%s391_s0 + $0x30] sm:$0xff]  ;;  %v21_v17 = vld [vmem:[%s391_s0 + $0x38] sm:$0xff] }
   0x4   :  { %v18_v10 = vld [vmem:[%s391_s0 + $0x20] sm:$0xff]  ;;  %v42_v16 = vmul.f32 %v286_v2, %v19_v11  ;;  %v43_v20 = vmul.f32 %v286_v2, %v20_v12  ;;  %v44_v21 = vmul.f32 %v286_v2, %v21_v17  ;;  %v23_v27 = vld [vmem:[%s391_s0 + $0x48] sm:$0xff]  ;;  %v24_v32 = vld [vmem:[%s391_s0 + $0x50] sm:$0xff] }
   0x5   :  { %v60_v13 = vadd.f32 %v293_v5, %v37_v3  ;;  %v61_v14 = vadd.f32 %v293_v5, %v38_v4  ;;  %v41_v15 = vmul.f32 %v286_v2, %v18_v10  ;;  %v62_v18 = vadd.f32 %v293_v5, %v39_v8  ;;  %v22_v22 = vld [vmem:[%s391_s0 + $0x40] sm:$0xff]  ;;  %v25_v33 = vld [vmem:[%s391_s0 + $0x58] sm:$0xff]  ;;  %v27_v39 = vld [vmem:[%s391_s0 + $0x68] sm:$0xff] }
   0x6   :  { %v63_v19 = vadd.f32 %v293_v5, %v40_v9  ;;  %v65_v26 = vadd.f32 %v293_v5, %v42_v16  ;;  %v66_v30 = vadd.f32 %v293_v5, %v43_v20  ;;  %v67_v31 = vadd.f32 %v293_v5, %v44_v21  ;;  %v26_v38 = vld [vmem:[%s391_s0 + $0x60] sm:$0xff]  ;;  %v28_v44 = vld [vmem:[%s391_s0 + $0x70] sm:$0xff]  ;;  %v29_v49 = vld [vmem:[%s391_s0 + $0x78] sm:$0xff] }
   0x7   :  { %v76_v23 = vmax.f32 %v60_v13, 0.0  ;;  %v77_v24 = vmax.f32 %v61_v14, 0.0  ;;  %v64_v25 = vadd.f32 %v293_v5, %v41_v15  ;;  %v78_v28 = vmax.f32 %v62_v18, 0.0 }
   0x8   :  { %v79_v29 = vmax.f32 %v63_v19, 0.0  ;;  %v81_v36 = vmax.f32 %v65_v26, 0.0  ;;  %v45_v37 = vmul.f32 %v286_v2, %v22_v22  ;;  %v82_v41 = vmax.f32 %v66_v30, 0.0 }
   0x9   :  { %v213_v34 = vpack.c.bf16 %v77_v24, %v76_v23  ;;  %v80_v35 = vmax.f32 %v64_v25, 0.0  ;;  %v83_v42 = vmax.f32 %v67_v31, 0.0  ;;  %v46_v43 = vmul.f32 %v286_v2, %v23_v27 }
   0xa   :  { %v218_v40 = vpack.c.bf16 %v79_v29, %v78_v28  ;;  %v68_v46 = vadd.f32 %v293_v5, %v45_v37  ;;  %v47_v47 = vmul.f32 %v286_v2, %v24_v32  ;;  %v48_v48 = vmul.f32 %v286_v2, %v25_v33 }
   0xb   :  { %214 = vst [vmem:[%s394_s3] sm:$0xff] %v213_v34   ;;  %v223_v45 = vpack.c.bf16 %v81_v36, %v80_v35  ;;  %v228_v50 = vpack.c.bf16 %v83_v42, %v82_v41  ;;  %v69_v51 = vadd.f32 %v293_v5, %v46_v43  ;;  %v49_v52 = vmul.f32 %v286_v2, %v26_v38 }
   0xc   :  { %250 = vst [vmem:[%s394_s3 + $0x8] sm:$0xff] %v218_v40   ;;  %v50_v53 = vmul.f32 %v286_v2, %v27_v39  ;;  %v84_v54 = vmax.f32 %v68_v46, 0.0  ;;  %v70_v55 = vadd.f32 %v293_v5, %v47_v47  ;;  %v71_v56 = vadd.f32 %v293_v5, %v48_v48 }
   0xd   :  { %251 = vst [vmem:[%s394_s3 + $0x10] sm:$0xff] %v223_v45   ;;  %v51_v57 = vmul.f32 %v286_v2, %v28_v44  ;;  %252 = vst [vmem:[%s394_s3 + $0x18] sm:$0xff] %v228_v50   ;;  %v85_v58 = vmax.f32 %v69_v51, 0.0  ;;  %v72_v59 = vadd.f32 %v293_v5, %v49_v52  ;;  %v52_v61 = vmul.f32 %v286_v2, %v29_v49 }
   0xe   :  { %v73_v60 = vadd.f32 %v293_v5, %v50_v53  ;;  %v86_v62 = vmax.f32 %v70_v55, 0.0  ;;  %v87_v63 = vmax.f32 %v71_v56, 0.0 }
   0xf   :  { %v74_v0 = vadd.f32 %v293_v5, %v51_v57  ;;  %v233_v1 = vpack.c.bf16 %v85_v58, %v84_v54  ;;  %v88_v3 = vmax.f32 %v72_v59, 0.0  ;;  %v75_v6 = vadd.f32 %v293_v5, %v52_v61 }
  0x10   :  { %v89_v4 = vmax.f32 %v73_v60, 0.0  ;;  %v238_v7 = vpack.c.bf16 %v87_v63, %v86_v62 }
  0x11   :  { %v90_v8 = vmax.f32 %v74_v0, 0.0  ;;  %253 = vst [vmem:[%s394_s3 + $0x20] sm:$0xff] %v233_v1   ;;  %v91_v10 = vmax.f32 %v75_v6, 0.0 }
  0x12   :  { %v243_v9 = vpack.c.bf16 %v89_v4, %v88_v3  ;;  %254 = vst [vmem:[%s394_s3 + $0x28] sm:$0xff] %v238_v7  }
  0x13   :  { %v248_v2 = vpack.c.bf16 %v91_v10, %v90_v8 }
  0x14   :  { %255 = vst [vmem:[%s394_s3 + $0x30] sm:$0xff] %v243_v9  }
  0x15   :  { %256 = vst [vmem:[%s394_s3 + $0x38] sm:$0xff] %v248_v2  }

// kernel: residual_forward.4
= control target key start
LH: loop header
LB: loop body
LE: loop exit
PB: predicated region body
PF: predicated region fallthrough
CT: control target
= control target key end

     0   :  { %vm90_vm0 = vcmask 293888   ;;  %vm115_vm1 = vcmask 1041408   ;;  %vm290_vm2 = vcmask 1040384   ;;  %s489_s1 = inlined_call_operand.vmem [shape: bf16[36,128], index: 1, kind: input, shape index: {}]   ;;  %s490_s0 = inlined_call_operand.vmem [shape: bf16[128,36], index: 0, kind: input, shape index: {}]   ;;  %s491_s2 = inlined_call_operand.vmem [shape: f32[128,128], index: 2, kind: output, shape index: {0}]   ;;  %s492_s3 = inlined_call_operand.vmem [shape: f32[8,128], index: 3, kind: output, shape index: {1}]  }
   0x1   :  { %v362_v0 = vld [vmem:[%s489_s1] sm:$0xff]   ;;  %v363_v1 = vld [vmem:[%s489_s1 + $0x8] sm:$0xff]   ;;  %v364_v2 = vld [vmem:[%s489_s1 + $0x10] ss:$0 sps:$4 sm:$0x33]  }
   0x2   :  { %332 = vmatprep.subr.bf16.mxu0 %v362_v0  ;;  %v365_v3 = vld [vmem:[%s490_s0] sm:$0xff]   ;;  %354 = vmatprep.subr.bf16.mxu1 %v362_v0  ;;  %v117_v5 = vsel %vm115_vm1, %v364_v2, 0  ;;  %v366_v6 = vld [vmem:[%s490_s0 + $0x8] sm:$0xff]   ;;  %v367_v8 = vld [vmem:[%s490_s0 + $0x10] sm:$0xff]  }
   0x3   :  { %333 = vmatpush3.bf16.msra.mxu0 %v362_v0  ;;  %357 = vmatpush3.bf16.msra.mxu1 %v362_v0  ;;  %v369_v4 = vld [vmem:[%s490_s0 + $0x20] sm:$0xff]   ;;  %v370_v7 = vld [vmem:[%s490_s0 + $0x28] sm:$0xff]   ;;  %v371_v9 = vld [vmem:[%s490_s0 + $0x30] sm:$0xff]  }
   0x4   :  { %334 = vmatprep.subr.bf16.mxu0 %v363_v1  ;;  %338 = vmatprep.mubr.msk.bf16.mxu0 %vm90_vm0, %v365_v3  ;;  %v368_v10 = vld [vmem:[%s490_s0 + $0x18] sm:$0xff]  }
   0x5   :  { %355 = vmatprep.subr.bf16.mxu1 %v363_v1  ;;  %346 = vmatprep.mubr.msk.bf16.mxu1 %vm90_vm0, %v369_v4  ;;  %v372_v11 = vld [vmem:[%s490_s0 + $0x38] sm:$0xff]  }
   0x7   :  { %335 = vmatpush3.bf16.msra.mxu0 %v363_v1  ;;  %358 = vmatpush3.bf16.msra.mxu1 %v363_v1 }
   0x8   :  { %360 = vmatprep.subr.msk.bf16.mxu0 %vm115_vm1, %v364_v2  ;;  %361 = vmatprep.subr.msk.bf16.mxu1 %vm115_vm1, %v364_v2 }
   0xb   :  { %337 = vmatpush3.bf16.msra.mxu0 %v117_v5  ;;  %359 = vmatpush3.bf16.msra.mxu1 %v117_v5 }
   0xe   :  { %339 = vmatmul.mubr.msk.bf16.vlgmr.msra.gmra.mrb[0].mxu0 %vm90_vm0, %v366_v6  ;;  %347 = vmatmul.mubr.msk.bf16.vlgmr.msra.gmra.mrb[0].mxu1 %vm90_vm0, %v370_v7 }
   0xf   :  { %342 = vmatprep.mubr.msk.bf16.mxu0 %vm90_vm0, %v367_v8  ;;  %350 = vmatprep.mubr.msk.bf16.mxu1 %vm90_vm0, %v371_v9 }
  0x16   :  { %343 = vmatmul.mubr.msk.bf16.gmra.mrb[4].mxu0 %vm90_vm0, %v368_v10  ;;  %351 = vmatmul.mubr.msk.bf16.gmra.mrb[4].mxu1 %vm90_vm0, %v372_v11 }
  0xe1   :  { %v340_v12 = vpop.f32.mrb[0].mxu0  ;;  %v348_v13 = vpop.f32.mrb[0].mxu1 }
  0xe2   :  { %218 = vst [vmem:[%s491_s2 + $0x10] sm:$0xff] %v340_v12  ;;  %v153_v14 = vpop.f32.mrb[1].mxu0  ;;  %226 = vst [vmem:[%s491_s2 + $0x50] sm:$0xff] %v348_v13  ;;  %v185_v15 = vpop.f32.mrb[1].mxu1  ;;  %v255_v23 = vmul.f32 %v340_v12, %v340_v12  ;;  %v263_v55 = vmul.f32 %v348_v13, %v348_v13 }
  0xe3   :  { %216 = vst [vmem:[%s491_s2] sm:$0xff] %v153_v14  ;;  %v341_v16 = vpop.f32.mrb[2].mxu0  ;;  %224 = vst [vmem:[%s491_s2 + $0x40] sm:$0xff] %v185_v15  ;;  %v349_v17 = vpop.f32.mrb[2].mxu1  ;;  %v253_v20 = vmul.f32 %v153_v14, %v153_v14  ;;  %v261_v49 = vmul.f32 %v185_v15, %v185_v15 }
  0xe4   :  { %219 = vst [vmem:[%s491_s2 + $0x18] sm:$0xff] %v341_v16  ;;  %v156_v18 = vpop.f32.mrb[3].mxu0  ;;  %227 = vst [vmem:[%s491_s2 + $0x58] sm:$0xff] %v349_v17  ;;  %v188_v19 = vpop.f32.mrb[3].mxu1  ;;  %v256_v26 = vmul.f32 %v341_v16, %v341_v16  ;;  %v264_v58 = vmul.f32 %v349_v17, %v349_v17 }
  0xe5   :  { %217 = vst [vmem:[%s491_s2 + $0x8] sm:$0xff] %v156_v18  ;;  %v232_v21 = vadd.f32 %v156_v18, %v153_v14  ;;  %v254_v22 = vmul.f32 %v156_v18, %v156_v18  ;;  %225 = vst [vmem:[%s491_s2 + $0x48] sm:$0xff] %v188_v19  ;;  %v262_v54 = vmul.f32 %v188_v19, %v188_v19 }
  0xe7   :  { %v233_v24 = vadd.f32 %v340_v12, %v232_v21  ;;  %v269_v25 = vadd.f32 %v254_v22, %v253_v20 }
  0xe9   :  { %v270_v27 = vadd.f32 %v269_v25, %v255_v23  ;;  %v344_v28 = vpop.f32.mrb[4].mxu0  ;;  %v234_v29 = vadd.f32 %v341_v16, %v233_v24  ;;  %v352_v30 = vpop.f32.mrb[4].mxu1 }
  0xea   :  { %222 = vst [vmem:[%s491_s2 + $0x30] sm:$0xff] %v344_v28  ;;  %v169_v31 = vpop.f32.mrb[5].mxu0  ;;  %230 = vst [vmem:[%s491_s2 + $0x70] sm:$0xff] %v352_v30  ;;  %v201_v32 = vpop.f32.mrb[5].mxu1  ;;  %v259_v43 = vmul.f32 %v344_v28, %v344_v28  ;;  %v267_v3 = vmul.f32 %v352_v30, %v352_v30 }
  0xeb   :  { %220 = vst [vmem:[%s491_s2 + $0x20] sm:$0xff] %v169_v31  ;;  %v235_v33 = vadd.f32 %v234_v29, %v169_v31  ;;  %v257_v34 = vmul.f32 %v169_v31, %v169_v31  ;;  %v271_v35 = vadd.f32 %v270_v27, %v256_v26  ;;  %v345_v36 = vpop.f32.mrb[6].mxu0  ;;  %228 = vst [vmem:[%s491_s2 + $0x60] sm:$0xff] %v201_v32  ;;  %v353_v37 = vpop.f32.mrb[6].mxu1 }
  0xec   :  { %223 = vst [vmem:[%s491_s2 + $0x38] sm:$0xff] %v345_v36  ;;  %v172_v38 = vpop.f32.mrb[7].mxu0  ;;  %231 = vst [vmem:[%s491_s2 + $0x78] sm:$0xff] %v353_v37  ;;  %v204_v39 = vpop.f32.mrb[7].mxu1  ;;  %v260_v46 = vmul.f32 %v345_v36, %v345_v36  ;;  %v265_v61 = vmul.f32 %v201_v32, %v201_v32  ;;  %v268_v6 = vmul.f32 %v353_v37, %v353_v37 }
  0xed   :  { %v272_v40 = vadd.f32 %v271_v35, %v257_v34  ;;  %221 = vst [vmem:[%s491_s2 + $0x28] sm:$0xff] %v172_v38  ;;  %v236_v41 = vadd.f32 %v235_v33, %v172_v38  ;;  %v258_v42 = vmul.f32 %v172_v38, %v172_v38  ;;  %229 = vst [vmem:[%s491_s2 + $0x68] sm:$0xff] %v204_v39 }
  0xee   :  { %v266_v2 = vmul.f32 %v204_v39, %v204_v39 }
  0xef   :  { %v237_v44 = vadd.f32 %v344_v28, %v236_v41  ;;  %v273_v45 = vadd.f32 %v272_v40, %v258_v42 }
  0xf1   :  { %v274_v47 = vadd.f32 %v273_v45, %v259_v43  ;;  %v238_v48 = vadd.f32 %v345_v36, %v237_v44 }
  0xf3   :  { %v239_v50 = vadd.f32 %v238_v48, %v185_v15  ;;  %v275_v51 = vadd.f32 %v274_v47, %v260_v46 }
  0xf5   :  { %v276_v52 = vadd.f32 %v275_v51, %v261_v49  ;;  %v240_v53 = vadd.f32 %v239_v50, %v188_v19 }
  0xf7   :  { %v241_v56 = vadd.f32 %v348_v13, %v240_v53  ;;  %v277_v57 = vadd.f32 %v276_v52, %v262_v54 }
  0xf9   :  { %v278_v59 = vadd.f32 %v277_v57, %v263_v55  ;;  %v242_v60 = vadd.f32 %v349_v17, %v241_v56 }
  0xfb   :  { %v243_v62 = vadd.f32 %v242_v60, %v201_v32  ;;  %v279_v63 = vadd.f32 %v278_v59, %v264_v58 }
  0xfd   :  { %v280_v0 = vadd.f32 %v279_v63, %v265_v61  ;;  %v244_v1 = vadd.f32 %v243_v62, %v204_v39 }
  0xff   :  { %v245_v4 = vadd.f32 %v352_v30, %v244_v1  ;;  %v281_v5 = vadd.f32 %v280_v0, %v266_v2 }
 0x101   :  { %v246_v7 = vadd.f32 %v353_v37, %v245_v4  ;;  %v282_v8 = vadd.f32 %v281_v5, %v267_v3 }
 0x103   :  { %v247_v9 = vrot.slane %v246_v7, 4  ;;  %v283_v10 = vadd.f32 %v282_v8, %v268_v6 }
 0x105   :  { %v248_v11 = vadd.f32 %v247_v9, %v246_v7  ;;  %v284_v12 = vrot.slane %v283_v10, 4 }
 0x107   :  { %v249_v13 = vrot.slane %v248_v11, 2  ;;  %v285_v14 = vadd.f32 %v284_v12, %v283_v10 }
 0x109   :  { %v250_v15 = vadd.f32 %v249_v13, %v248_v11  ;;  %v286_v16 = vrot.slane %v285_v14, 2 }
 0x10b   :  { %v251_v17 = vrot.slane %v250_v15, 1  ;;  %v287_v18 = vadd.f32 %v286_v16, %v285_v14 }
 0x10d   :  { %v288_v19 = vrot.slane %v287_v18, 1  ;;  %v252_v20 = vadd.f32 %v251_v17, %v250_v15 }
 0x10f   :  { %v289_v21 = vadd.f32 %v288_v19, %v287_v18 }
 0x111   :  { %v291_v22 = vsel %vm290_vm2, %v252_v20, %v289_v21 }
 0x112   :  { %v292_v23 = vsel %vm115_vm1, %v291_v22, 0.0 }
 0x113   :  { %293 = vst [vmem:[%s492_s3] sm:$0xff] %v292_v23 }

// kernel: residual_forward.6
= control target key start
LH: loop header
LB: loop body
LE: loop exit
PB: predicated region body
PF: predicated region fallthrough
CT: control target
= control target key end

     0   :  { %vm106_vm0 = vcmask 588800   ;;  %vm131_vm1 = vcmask 1043456   ;;  %vm306_vm2 = vcmask 1040384   ;;  %vm308_vm3 = vcmask 1041408   ;;  %s522_s1 = inlined_call_operand.vmem [shape: bf16[72,128], index: 1, kind: input, shape index: {}]   ;;  %s523_s0 = inlined_call_operand.vmem [shape: bf16[128,72], index: 0, kind: input, shape index: {}]   ;;  %s524_s2 = inlined_call_operand.vmem [shape: f32[128,128], index: 2, kind: output, shape index: {0}]   ;;  %s525_s3 = inlined_call_operand.vmem [shape: f32[8,128], index: 3, kind: output, shape index: {1}]  }
   0x1   :  { %v391_v0 = vld [vmem:[%s522_s1] sm:$0xff]   ;;  %v392_v1 = vld [vmem:[%s522_s1 + $0x8] sm:$0xff]   ;;  %v393_v2 = vld [vmem:[%s522_s1 + $0x10] sm:$0xff]  }
   0x2   :  { %353 = vmatprep.subr.bf16.mxu0 %v391_v0  ;;  %379 = vmatprep.subr.bf16.mxu1 %v391_v0  ;;  %v396_v3 = vld [vmem:[%s523_s0] sm:$0xff]   ;;  %v394_v4 = vld [vmem:[%s522_s1 + $0x18] sm:$0xff]   ;;  %v397_v8 = vld [vmem:[%s523_s0 + $0x8] sm:$0xff]  }
   0x3   :  { %354 = vmatpush3.bf16.msra.mxu0 %v391_v0  ;;  %384 = vmatpush3.bf16.msra.mxu1 %v391_v0  ;;  %v400_v5 = vld [vmem:[%s523_s0 + $0x20] sm:$0xff]   ;;  %v401_v9 = vld [vmem:[%s523_s0 + $0x28] sm:$0xff]   ;;  %v398_v10 = vld [vmem:[%s523_s0 + $0x10] sm:$0xff]  }
   0x4   :  { %355 = vmatprep.subr.bf16.mxu0 %v392_v1  ;;  %380 = vmatprep.subr.bf16.mxu1 %v392_v1  ;;  %v395_v6 = vld [vmem:[%s522_s1 + $0x20] ss:$0 sps:$4 sm:$0xff]   ;;  %v402_v11 = vld [vmem:[%s523_s0 + $0x30] sm:$0xff]   ;;  %v399_v12 = vld [vmem:[%s523_s0 + $0x18] sm:$0xff]  }
   0x5   :  { %363 = vmatprep.mubr.msk.bf16.mxu0 %vm106_vm0, %v396_v3  ;;  %371 = vmatprep.mubr.msk.bf16.mxu1 %vm106_vm0, %v400_v5  ;;  %v133_v7 = vsel %vm131_vm1, %v395_v6, 0  ;;  %v403_v13 = vld [vmem:[%s523_s0 + $0x38] sm:$0xff]  }
   0x7   :  { %356 = vmatpush3.bf16.msra.mxu0 %v392_v1  ;;  %385 = vmatpush3.bf16.msra.mxu1 %v392_v1 }
   0x8   :  { %357 = vmatprep.subr.bf16.mxu0 %v393_v2  ;;  %381 = vmatprep.subr.bf16.mxu1 %v393_v2 }
   0xb   :  { %358 = vmatpush3.bf16.msra.mxu0 %v393_v2  ;;  %386 = vmatpush3.bf16.msra.mxu1 %v393_v2 }
   0xc   :  { %359 = vmatprep.subr.bf16.mxu0 %v394_v4  ;;  %382 = vmatprep.subr.bf16.mxu1 %v394_v4 }
   0xf   :  { %360 = vmatpush3.bf16.msra.mxu0 %v394_v4  ;;  %387 = vmatpush3.bf16.msra.mxu1 %v394_v4 }
  0x10   :  { %389 = vmatprep.subr.msk.bf16.mxu0 %vm131_vm1, %v395_v6  ;;  %390 = vmatprep.subr.msk.bf16.mxu1 %vm131_vm1, %v395_v6 }
  0x13   :  { %362 = vmatpush3.bf16.msra.mxu0 %v133_v7  ;;  %388 = vmatpush3.bf16.msra.mxu1 %v133_v7 }
  0x16   :  { %364 = vmatmul.mubr.msk.bf16.vlgmr.msra.gmra.mrb[0].mxu0 %vm106_vm0, %v397_v8  ;;  %372 = vmatmul.mubr.msk.bf16.vlgmr.msra.gmra.mrb[0].mxu1 %vm106_vm0, %v401_v9 }
  0x17   :  { %367 = vmatprep.mubr.msk.bf16.mxu0 %vm106_vm0, %v398_v10  ;;  %375 = vmatprep.mubr.msk.bf16.mxu1 %vm106_vm0, %v402_v11 }
  0x1e   :  { %368 = vmatmul.mubr.msk.bf16.gmra.mrb[4].mxu0 %vm106_vm0, %v399_v12  ;;  %376 = vmatmul.mubr.msk.bf16.gmra.mrb[4].mxu1 %vm106_vm0, %v403_v13 }
  0xe9   :  { %v365_v14 = vpop.f32.mrb[0].mxu0  ;;  %v373_v15 = vpop.f32.mrb[0].mxu1 }
  0xea   :  { %234 = vst [vmem:[%s524_s2 + $0x10] sm:$0xff] %v365_v14  ;;  %v169_v16 = vpop.f32.mrb[1].mxu0  ;;  %242 = vst [vmem:[%s524_s2 + $0x50] sm:$0xff] %v373_v15  ;;  %v201_v17 = vpop.f32.mrb[1].mxu1  ;;  %v271_v25 = vmul.f32 %v365_v14, %v365_v14  ;;  %v279_v57 = vmul.f32 %v373_v15, %v373_v15 }
  0xeb   :  { %232 = vst [vmem:[%s524_s2] sm:$0xff] %v169_v16  ;;  %v366_v18 = vpop.f32.mrb[2].mxu0  ;;  %240 = vst [vmem:[%s524_s2 + $0x40] sm:$0xff] %v201_v17  ;;  %v374_v19 = vpop.f32.mrb[2].mxu1  ;;  %v269_v22 = vmul.f32 %v169_v16, %v169_v16  ;;  %v277_v51 = vmul.f32 %v201_v17, %v201_v17 }
  0xec   :  { %235 = vst [vmem:[%s524_s2 + $0x18] sm:$0xff] %v366_v18  ;;  %v172_v20 = vpop.f32.mrb[3].mxu0  ;;  %243 = vst [vmem:[%s524_s2 + $0x58] sm:$0xff] %v374_v19  ;;  %v204_v21 = vpop.f32.mrb[3].mxu1  ;;  %v272_v28 = vmul.f32 %v366_v18, %v366_v18  ;;  %v280_v60 = vmul.f32 %v374_v19, %v374_v19 }
  0xed   :  { %233 = vst [vmem:[%s524_s2 + $0x8] sm:$0xff] %v172_v20  ;;  %v248_v23 = vadd.f32 %v172_v20, %v169_v16  ;;  %v270_v24 = vmul.f32 %v172_v20, %v172_v20  ;;  %241 = vst [vmem:[%s524_s2 + $0x48] sm:$0xff] %v204_v21  ;;  %v278_v56 = vmul.f32 %v204_v21, %v204_v21 }
  0xef   :  { %v249_v26 = vadd.f32 %v365_v14, %v248_v23  ;;  %v285_v27 = vadd.f32 %v270_v24, %v269_v22 }
  0xf1   :  { %v286_v29 = vadd.f32 %v285_v27, %v271_v25  ;;  %v369_v30 = vpop.f32.mrb[4].mxu0  ;;  %v250_v31 = vadd.f32 %v366_v18, %v249_v26  ;;  %v377_v32 = vpop.f32.mrb[4].mxu1 }
  0xf2   :  { %238 = vst [vmem:[%s524_s2 + $0x30] sm:$0xff] %v369_v30  ;;  %v185_v33 = vpop.f32.mrb[5].mxu0  ;;  %246 = vst [vmem:[%s524_s2 + $0x70] sm:$0xff] %v377_v32  ;;  %v217_v34 = vpop.f32.mrb[5].mxu1  ;;  %v275_v45 = vmul.f32 %v369_v30, %v369_v30  ;;  %v283_v5 = vmul.f32 %v377_v32, %v377_v32 }
  0xf3   :  { %236 = vst [vmem:[%s524_s2 + $0x20] sm:$0xff] %v185_v33  ;;  %v251_v35 = vadd.f32 %v250_v31, %v185_v33  ;;  %v273_v36 = vmul.f32 %v185_v33, %v185_v33  ;;  %v287_v37 = vadd.f32 %v286_v29, %v272_v28  ;;  %v370_v38 = vpop.f32.mrb[6].mxu0  ;;  %244 = vst [vmem:[%s524_s2 + $0x60] sm:$0xff] %v217_v34  ;;  %v378_v39 = vpop.f32.mrb[6].mxu1 }
  0xf4   :  { %239 = vst [vmem:[%s524_s2 + $0x38] sm:$0xff] %v370_v38  ;;  %v188_v40 = vpop.f32.mrb[7].mxu0  ;;  %247 = vst [vmem:[%s524_s2 + $0x78] sm:$0xff] %v378_v39  ;;  %v220_v41 = vpop.f32.mrb[7].mxu1  ;;  %v276_v48 = vmul.f32 %v370_v38, %v370_v38  ;;  %v281_v63 = vmul.f32 %v217_v34, %v217_v34  ;;  %v284_v8 = vmul.f32 %v378_v39, %v378_v39 }
  0xf5   :  { %v288_v42 = vadd.f32 %v287_v37, %v273_v36  ;;  %237 = vst [vmem:[%s524_s2 + $0x28] sm:$0xff] %v188_v40  ;;  %v252_v43 = vadd.f32 %v251_v35, %v188_v40  ;;  %v274_v44 = vmul.f32 %v188_v40, %v188_v40  ;;  %245 = vst [vmem:[%s524_s2 + $0x68] sm:$0xff] %v220_v41 }
  0xf6   :  { %v282_v4 = vmul.f32 %v220_v41, %v220_v41 }
  0xf7   :  { %v253_v46 = vadd.f32 %v369_v30, %v252_v43  ;;  %v289_v47 = vadd.f32 %v288_v42, %v274_v44 }
  0xf9   :  { %v290_v49 = vadd.f32 %v289_v47, %v275_v45  ;;  %v254_v50 = vadd.f32 %v370_v38, %v253_v46 }
  0xfb   :  { %v255_v52 = vadd.f32 %v254_v50, %v201_v17  ;;  %v291_v53 = vadd.f32 %v290_v49, %v276_v48 }
  0xfd   :  { %v292_v54 = vadd.f32 %v291_v53, %v277_v51  ;;  %v256_v55 = vadd.f32 %v255_v52, %v204_v21 }
  0xff   :  { %v257_v58 = vadd.f32 %v373_v15, %v256_v55  ;;  %v293_v59 = vadd.f32 %v292_v54, %v278_v56 }
 0x101   :  { %v294_v61 = vadd.f32 %v293_v59, %v279_v57  ;;  %v258_v62 = vadd.f32 %v374_v19, %v257_v58 }
 0x103   :  { %v259_v0 = vadd.f32 %v258_v62, %v217_v34  ;;  %v295_v1 = vadd.f32 %v294_v61, %v280_v60 }
 0x105   :  { %v296_v2 = vadd.f32 %v295_v1, %v281_v63  ;;  %v260_v3 = vadd.f32 %v259_v0, %v220_v41 }
 0x107   :  { %v261_v6 = vadd.f32 %v377_v32, %v260_v3  ;;  %v297_v7 = vadd.f32 %v296_v2, %v282_v4 }
 0x109   :  { %v262_v9 = vadd.f32 %v378_v39, %v261_v6  ;;  %v298_v10 = vadd.f32 %v297_v7, %v283_v5 }
 0x10b   :  { %v263_v11 = vrot.slane %v262_v9, 4  ;;  %v299_v12 = vadd.f32 %v298_v10, %v284_v8 }
 0x10d   :  { %v264_v13 = vadd.f32 %v263_v11, %v262_v9  ;;  %v300_v14 = vrot.slane %v299_v12, 4 }
 0x10f   :  { %v265_v15 = vrot.slane %v264_v13, 2  ;;  %v301_v16 = vadd.f32 %v300_v14, %v299_v12 }
 0x111   :  { %v266_v17 = vadd.f32 %v265_v15, %v264_v13  ;;  %v302_v18 = vrot.slane %v301_v16, 2 }
 0x113   :  { %v267_v19 = vrot.slane %v266_v17, 1  ;;  %v303_v20 = vadd.f32 %v302_v18, %v301_v16 }
 0x115   :  { %v304_v21 = vrot.slane %v303_v20, 1  ;;  %v268_v22 = vadd.f32 %v267_v19, %v266_v17 }
 0x117   :  { %v305_v23 = vadd.f32 %v304_v21, %v303_v20 }
 0x119   :  { %v307_v24 = vsel %vm306_vm2, %v268_v22, %v305_v23 }
 0x11a   :  { %v309_v25 = vsel %vm308_vm3, %v307_v24, 0.0 }
 0x11b   :  { %310 = vst [vmem:[%s525_s3] sm:$0xff] %v309_v25 }

// kernel: residual_forward.7
= control target key start
LH: loop header
LB: loop body
LE: loop exit
PB: predicated region body
PF: predicated region fallthrough
CT: control target
= control target key end

     0   :  { %vm103_vm0 = vcmask 1041408   ;;  %vm78_vm1 = vcmask 31744   ;;  %s578_s4 = inlined_call_operand.vmem [shape: bf16[4,128], index: 4, kind: input, shape index: {}]   ;;  %s579_s3 = inlined_call_operand.vmem [shape: bf16[128,4], index: 3, kind: input, shape index: {}]   ;;  %s580_s0 = inlined_call_operand.vmem [shape: f32[128,128], index: 0, kind: input, shape index: {}, may-alias: {0,5}]   ;;  %s581_s1 = inlined_call_operand.vmem [shape: f32[1,128], index: 1, kind: input, shape index: {}]   ;;  %s582_s2 = inlined_call_operand.vmem [shape: f32[1,128], index: 2, kind: input, shape index: {}]   ;;  %s583_s5 = inlined_call_operand.vmem [shape: f32[128,128], index: 5, kind: output, shape index: {}, may-alias: {0,5}]  }
   0x1   :  { %v37_v0 = vld [vmem:[%s578_s4] sm:$0x3]  ;;  %v369_v4 = vld [vmem:[%s579_s3 + $0x8] sm:$0xff]   ;;  %v371_v6 = vld [vmem:[%s579_s3 + $0x10] sm:$0xff]  }
   0x2   :  { %365 = vmatprep.subr.msk.bf16.mxu0 %vm103_vm0, %v37_v0  ;;  %366 = vmatprep.subr.msk.bf16.mxu1 %vm103_vm0, %v37_v0  ;;  %v105_v1 = vsel %vm103_vm0, %v37_v0, 0  ;;  %v367_v2 = vld [vmem:[%s579_s3] sm:$0xff]   ;;  %v370_v5 = vld [vmem:[%s579_s3 + $0x28] sm:$0xff]   ;;  %v372_v7 = vld [vmem:[%s579_s3 + $0x30] sm:$0xff]  }
   0x3   :  { %346 = vmatpush3.bf16.msra.mxu0 %v105_v1  ;;  %364 = vmatpush3.bf16.msra.mxu1 %v105_v1  ;;  %v368_v3 = vld [vmem:[%s579_s3 + $0x20] sm:$0xff]   ;;  %v373_v8 = vld [vmem:[%s579_s3 + $0x18] sm:$0xff]   ;;  %v206_v10 = vld [vmem:[%s580_s0 + $0x10] sm:$0xff] }
   0x4   :  { %347 = vmatprep.mubr.msk.bf16.mxu0 %vm78_vm1, %v367_v2  ;;  %355 = vmatprep.mubr.msk.bf16.mxu1 %vm78_vm1, %v368_v3  ;;  %v374_v9 = vld [vmem:[%s579_s3 + $0x38] sm:$0xff]   ;;  %v446_v11 = vld [vmem:[%s581_s1] ss:$0 sm:$0xff]  ;;  %v214_v12 = vld [vmem:[%s580_s0 + $0x50] sm:$0xff] }
   0x5   :  { %v204_v13 = vld [vmem:[%s580_s0] sm:$0xff]  ;;  %v207_v15 = vld [vmem:[%s580_s0 + $0x18] sm:$0xff]  ;;  %v229_v16 = vmul.f32 %v446_v11, %v206_v10  ;;  %v205_v18 = vld [vmem:[%s580_s0 + $0x8] sm:$0xff]  ;;  %v237_v21 = vmul.f32 %v446_v11, %v214_v12 }
   0x6   :  { %348 = vmatmul.mubr.msk.bf16.vlgmr.msra.gmra.mrb[0].mxu0 %vm78_vm1, %v369_v4  ;;  %356 = vmatmul.mubr.msk.bf16.vlgmr.msra.gmra.mrb[0].mxu1 %vm78_vm1, %v370_v5  ;;  %v212_v14 = vld [vmem:[%s580_s0 + $0x40] sm:$0xff]  ;;  %v215_v17 = vld [vmem:[%s580_s0 + $0x58] sm:$0xff]  ;;  %v213_v19 = vld [vmem:[%s580_s0 + $0x48] sm:$0xff]  ;;  %v227_v22 = vmul.f32 %v446_v11, %v204_v13  ;;  %v230_v25 = vmul.f32 %v446_v11, %v207_v15  ;;  %v228_v27 = vmul.f32 %v446_v11, %v205_v18 }
   0x7   :  { %351 = vmatprep.mubr.msk.bf16.mxu0 %vm78_vm1, %v371_v6  ;;  %359 = vmatprep.mubr.msk.bf16.mxu1 %vm78_vm1, %v372_v7  ;;  %v473_v20 = vld [vmem:[%s582_s2] ss:$0 sm:$0xff]  ;;  %v210_v23 = vld [vmem:[%s580_s0 + $0x30] sm:$0xff]  ;;  %v235_v24 = vmul.f32 %v446_v11, %v212_v14  ;;  %v238_v26 = vmul.f32 %v446_v11, %v215_v17  ;;  %v236_v28 = vmul.f32 %v446_v11, %v213_v19  ;;  %v211_v38 = vld [vmem:[%s580_s0 + $0x38] sm:$0xff] }
   0x8   :  { %v252_v29 = vadd.f32 %v473_v20, %v229_v16  ;;  %v233_v30 = vmul.f32 %v446_v11, %v210_v23  ;;  %v218_v31 = vld [vmem:[%s580_s0 + $0x70] sm:$0xff]  ;;  %v260_v32 = vadd.f32 %v473_v20, %v237_v21  ;;  %v250_v33 = vadd.f32 %v473_v20, %v227_v22  ;;  %v208_v34 = vld [vmem:[%s580_s0 + $0x20] sm:$0xff]  ;;  %v219_v39 = vld [vmem:[%s580_s0 + $0x78] sm:$0xff] }
   0x9   :  { %v216_v35 = vld [vmem:[%s580_s0 + $0x60] sm:$0xff]  ;;  %v258_v36 = vadd.f32 %v473_v20, %v235_v24  ;;  %v253_v37 = vadd.f32 %v473_v20, %v230_v25  ;;  %v261_v41 = vadd.f32 %v473_v20, %v238_v26  ;;  %v251_v42 = vadd.f32 %v473_v20, %v228_v27  ;;  %v209_v45 = vld [vmem:[%s580_s0 + $0x28] sm:$0xff] }
   0xa   :  { %v259_v43 = vadd.f32 %v473_v20, %v236_v28  ;;  %v241_v44 = vmul.f32 %v446_v11, %v218_v31  ;;  %v256_v49 = vadd.f32 %v473_v20, %v233_v30  ;;  %v231_v50 = vmul.f32 %v446_v11, %v208_v34  ;;  %v217_v58 = vld [vmem:[%s580_s0 + $0x68] sm:$0xff] }
   0xb   :  { %v239_v51 = vmul.f32 %v446_v11, %v216_v35  ;;  %v234_v56 = vmul.f32 %v446_v11, %v211_v38  ;;  %v242_v57 = vmul.f32 %v446_v11, %v219_v39  ;;  %v232_v0 = vmul.f32 %v446_v11, %v209_v45 }
   0xc   :  { %v264_v13 = vadd.f32 %v473_v20, %v241_v44  ;;  %v254_v14 = vadd.f32 %v473_v20, %v231_v50 }
   0xd   :  { %v262_v15 = vadd.f32 %v473_v20, %v239_v51  ;;  %v257_v16 = vadd.f32 %v473_v20, %v234_v56  ;;  %v265_v18 = vadd.f32 %v473_v20, %v242_v57  ;;  %v255_v19 = vadd.f32 %v473_v20, %v232_v0 }
   0xe   :  { %352 = vmatmul.mubr.msk.bf16.gmra.mrb[4].mxu0 %vm78_vm1, %v373_v8  ;;  %360 = vmatmul.mubr.msk.bf16.gmra.mrb[4].mxu1 %vm78_vm1, %v374_v9  ;;  %v240_v9 = vmul.f32 %v446_v11, %v217_v58 }
  0x10   :  { %v263_v24 = vadd.f32 %v473_v20, %v240_v9 }
  0xd9   :  { %v349_v40 = vpop.f32.mrb[0].mxu0  ;;  %v357_v47 = vpop.f32.mrb[0].mxu1 }
  0xda   :  { %v268_v46 = vadd.f32 %v349_v40, %v252_v29  ;;  %v141_v48 = vpop.f32.mrb[1].mxu0  ;;  %v276_v52 = vadd.f32 %v357_v47, %v260_v32  ;;  %v173_v54 = vpop.f32.mrb[1].mxu1 }
  0xdb   :  { %v266_v53 = vadd.f32 %v250_v33, %v141_v48  ;;  %v350_v55 = vpop.f32.mrb[2].mxu0  ;;  %v274_v60 = vadd.f32 %v258_v36, %v173_v54  ;;  %v358_v62 = vpop.f32.mrb[2].mxu1 }
  0xdc   :  { %v284_v59 = vmax.f32 %v268_v46, 0.0  ;;  %v269_v61 = vadd.f32 %v350_v55, %v253_v37  ;;  %v144_v63 = vpop.f32.mrb[3].mxu0  ;;  %v292_v1 = vmax.f32 %v276_v52, 0.0  ;;  %v277_v3 = vadd.f32 %v358_v62, %v261_v41  ;;  %v176_v5 = vpop.f32.mrb[3].mxu1 }
  0xdd   :  { %v282_v2 = vmax.f32 %v266_v53, 0.0  ;;  %v267_v4 = vadd.f32 %v251_v42, %v144_v63  ;;  %v290_v6 = vmax.f32 %v274_v60, 0.0  ;;  %v275_v8 = vadd.f32 %v259_v43, %v176_v5 }
  0xde   :  { %300 = vst [vmem:[%s583_s5 + $0x10] sm:$0xff] %v284_v59  ;;  %v285_v7 = vmax.f32 %v269_v61, 0.0  ;;  %308 = vst [vmem:[%s583_s5 + $0x50] sm:$0xff] %v292_v1  ;;  %v293_v10 = vmax.f32 %v277_v3, 0.0 }
  0xdf   :  { %298 = vst [vmem:[%s583_s5] sm:$0xff] %v282_v2  ;;  %v283_v12 = vmax.f32 %v267_v4, 0.0  ;;  %306 = vst [vmem:[%s583_s5 + $0x40] sm:$0xff] %v290_v6  ;;  %v291_v11 = vmax.f32 %v275_v8, 0.0 }
  0xe0   :  { %301 = vst [vmem:[%s583_s5 + $0x18] sm:$0xff] %v285_v7  ;;  %309 = vst [vmem:[%s583_s5 + $0x58] sm:$0xff] %v293_v10 }
  0xe1   :  { %299 = vst [vmem:[%s583_s5 + $0x8] sm:$0xff] %v283_v12  ;;  %v353_v17 = vpop.f32.mrb[4].mxu0  ;;  %307 = vst [vmem:[%s583_s5 + $0x48] sm:$0xff] %v291_v11  ;;  %v361_v22 = vpop.f32.mrb[4].mxu1 }
  0xe2   :  { %v272_v21 = vadd.f32 %v353_v17, %v256_v49  ;;  %v157_v23 = vpop.f32.mrb[5].mxu0  ;;  %v280_v25 = vadd.f32 %v361_v22, %v264_v13  ;;  %v189_v27 = vpop.f32.mrb[5].mxu1 }
  0xe3   :  { %v270_v26 = vadd.f32 %v254_v14, %v157_v23  ;;  %v354_v28 = vpop.f32.mrb[6].mxu0  ;;  %v278_v30 = vadd.f32 %v262_v15, %v189_v27  ;;  %v362_v32 = vpop.f32.mrb[6].mxu1 }
  0xe4   :  { %v288_v29 = vmax.f32 %v272_v21, 0.0  ;;  %v273_v31 = vadd.f32 %v354_v28, %v257_v16  ;;  %v160_v33 = vpop.f32.mrb[7].mxu0  ;;  %v296_v34 = vmax.f32 %v280_v25, 0.0  ;;  %v281_v36 = vadd.f32 %v362_v32, %v265_v18  ;;  %v192_v38 = vpop.f32.mrb[7].mxu1 }
  0xe5   :  { %v286_v35 = vmax.f32 %v270_v26, 0.0  ;;  %v271_v37 = vadd.f32 %v255_v19, %v160_v33  ;;  %v294_v39 = vmax.f32 %v278_v30, 0.0  ;;  %v279_v40 = vadd.f32 %v263_v24, %v192_v38 }
  0xe6   :  { %304 = vst [vmem:[%s583_s5 + $0x30] sm:$0xff] %v288_v29  ;;  %v289_v20 = vmax.f32 %v273_v31, 0.0  ;;  %312 = vst [vmem:[%s583_s5 + $0x70] sm:$0xff] %v296_v34  ;;  %v297_v41 = vmax.f32 %v281_v36, 0.0 }
  0xe7   :  { %302 = vst [vmem:[%s583_s5 + $0x20] sm:$0xff] %v286_v35  ;;  %v287_v42 = vmax.f32 %v271_v37, 0.0  ;;  %310 = vst [vmem:[%s583_s5 + $0x60] sm:$0xff] %v294_v39  ;;  %v295_v43 = vmax.f32 %v279_v40, 0.0 }
  0xe8   :  { %305 = vst [vmem:[%s583_s5 + $0x38] sm:$0xff] %v289_v20  ;;  %313 = vst [vmem:[%s583_s5 + $0x78] sm:$0xff] %v297_v41 }
  0xe9   :  { %303 = vst [vmem:[%s583_s5 + $0x28] sm:$0xff] %v287_v42  ;;  %311 = vst [vmem:[%s583_s5 + $0x68] sm:$0xff] %v295_v43 }

</bundles_post_ra>
